<compile_context>
chip_gen: v5e
topology: v5e:2x2
jax: 0.10.0
libtpu: 0.0.40
codegen_flags: <defaults>
</compile_context>

<pallas_src>
import jax
import jax.numpy as jnp
from jax.experimental import pallas as pl
from jax.experimental.pallas import tpu as pltpu


def _biasfree_layernorm_kernel(x_ref, w_ref, o_ref):
    # x_ref: (TM, C) token tile; w_ref: (1, C) fp32 weight (resident); o_ref: (TM, C).
    x = x_ref[...].astype(jnp.float32)
    c = x.shape[-1]
    inv_c = jnp.float32(1.0 / c)

    # Single-pass population variance in fp32: var = E[x^2] - E[x]^2.
    s1 = jnp.sum(x, axis=-1, keepdims=True) * inv_c          # mean
    s2 = jnp.sum(x * x, axis=-1, keepdims=True) * inv_c      # E[x^2]
    var = jnp.maximum(s2 - s1 * s1, 0.0)
    inv = jax.lax.rsqrt(var + 1e-5)

    # Bias-free: scale only, NO mean subtraction (matches the PyTorch module).
    o_ref[...] = (x * (inv * w_ref[...])).astype(o_ref.dtype)


def _round_down_mult8(v):
    return max(8, (v // 8) * 8)


def _pick_tm(n_tok, C, in_bytes, out_bytes):
    """Row-tile size: big enough to amortize per-step overhead, small enough for VMEM."""
    if n_tok <= 8:
        return n_tok
    # Per-row VMEM footprint of the pipeline:
    #   2x double-buffered input + 2x double-buffered output + ~4 fp32 temporaries.
    bytes_per_row = C * (2 * in_bytes + 2 * out_bytes + 4 * 4)
    # Roofline target: ~2 MiB fp32 per tile (measured >=85% of HBM roofline there).
    tm_roofline = _round_down_mult8((2 << 20) // (4 * C))
    # VMEM cap: keep the total working set under ~24 MiB (inside the 32 MiB scoped
    # limit we request; comfortably within v7x's 64 MiB physical VMEM).
    tm_vmem = _round_down_mult8((24 << 20) // bytes_per_row)
    tm = min(tm_roofline, tm_vmem)
    # Keep at least 2 grid steps so v7x's two TensorCores both get work and the
    # pipeline can actually overlap DMA with compute.
    tm = min(tm, _round_down_mult8(pl.cdiv(n_tok, 2)))
    tm = min(tm, _round_down_mult8(n_tok))
    return tm


def biasfree_layernorm(x, weight):
    """x: (..., C), weight: (C,). Returns x / sqrt(var(x, -1) + 1e-5) * weight."""
    orig_shape = x.shape
    C = orig_shape[-1]
    assert weight.shape == (C,)

    x2 = x.reshape(-1, C)
    n_tok = x2.shape[0]

    in_bytes = x2.dtype.itemsize
    out_bytes = in_bytes
    tm = _pick_tm(n_tok, C, in_bytes, out_bytes)

    # Pad the token axis to a multiple of tm instead of falling back to one giant
    # block. Zero rows normalize to zero and are sliced off afterwards.
    n_pad = pl.cdiv(n_tok, tm) * tm
    if n_pad != n_tok:
        x2 = jnp.pad(x2, ((0, n_pad - n_tok), (0, 0)))

    grid = (n_pad // tm,)

    # Pre-cast weight to fp32 once in the wrapper; constant index_map keeps the
    # (1, C) block resident across the grid.
    w2 = weight.astype(jnp.float32).reshape(1, C)

    # Scoped VMEM: enough for the double-buffered tiles plus fp32 temporaries.
    # Explicitly >= 32 MiB (v5e default is only 16 MiB), capped at 56 MiB so it
    # still fits v7x's 64 MiB physical VMEM.
    need = tm * C * (2 * in_bytes + 2 * out_bytes + 4 * 4) + (4 << 20)
    vmem_limit = int(min(max(need, 32 << 20), 56 << 20))

    out = pl.pallas_call(
        _biasfree_layernorm_kernel,
        out_shape=jax.ShapeDtypeStruct((n_pad, C), x.dtype),
        grid_spec=pltpu.PrefetchScalarGridSpec(
            num_scalar_prefetch=0,
            grid=grid,
            in_specs=[
                pl.BlockSpec((tm, C), lambda i: (i, 0)),
                pl.BlockSpec((1, C), lambda i: (0, 0)),
            ],
            out_specs=pl.BlockSpec((tm, C), lambda i: (i, 0)),
        ),
        compiler_params=pltpu.CompilerParams(
            dimension_semantics=("parallel",),
            vmem_limit_bytes=vmem_limit,
        ),
    )(x2, w2)

    if n_pad != n_tok:
        out = out[:n_tok]
    return out.reshape(orig_shape)


if __name__ == "__main__":
    k0, k1, k2 = jax.random.split(jax.random.PRNGKey(0), 3)

    # Primary case: Restormer-style (B, H*W, C) tokens with lane-dense C=128.
    B, S, C = 2, 64, 128
    x = jax.random.normal(k0, (B, S, C), dtype=jnp.float32)
    weight = jnp.ones((C,), dtype=jnp.float32)  # matches nn.Parameter(torch.ones(C))

    out = jax.block_until_ready(biasfree_layernorm(x, weight))
    var = jnp.var(x, axis=-1, keepdims=True)            # unbiased=False (population var)
    ref = x / jnp.sqrt(var + 1e-5) * weight
    assert out.shape == x.shape and out.dtype == x.dtype
    assert jnp.max(jnp.abs(out - ref)) < 2e-5

    # Secondary case: small non-lane-dense C and a token count that needs padding,
    # with a non-trivial weight, to exercise the padding path.
    x_s = jax.random.normal(k1, (3, 10, 32), dtype=jnp.float32) * 3.0
    w_s = jax.random.normal(k2, (32,), dtype=jnp.float32)
    out_s = jax.block_until_ready(biasfree_layernorm(x_s, w_s))
    var_s = jnp.var(x_s, axis=-1, keepdims=True)
    ref_s = x_s / jnp.sqrt(var_s + 1e-5) * w_s
    assert out_s.shape == x_s.shape and out_s.dtype == x_s.dtype
    assert jnp.max(jnp.abs(out_s - ref_s)) < 2e-4

    print("KERNEL_OK")
</pallas_src>

<mosaic_0001>
module attributes {stable_mosaic.version = 11 : i64} {
  func.func @_biasfree_layernorm_kernel(%arg0: i32, %arg1: memref<64x128xf32, #tpu.memory_space<vmem>>, %arg2: memref<1x128xf32, #tpu.memory_space<vmem>>, %arg3: memref<64x128xf32, #tpu.memory_space<vmem>>) attributes {dimension_semantics = [#tpu.dimension_semantics<parallel>], iteration_bounds = array<i64: 2>, scalar_prefetch = 0 : i64, scratch_operands = 0 : i64, tpu.core_type = #tpu.core_type<tc>, window_params = [{transform_indices = @transform_0, window_bounds = array<i64: 64, 128>}, {pipeline_mode = #tpu.pipeline_mode<synchronous>, transform_indices = @transform_1, window_bounds = array<i64: 1, 128>}, {transform_indices = @transform_2, window_bounds = array<i64: 64, 128>}]} {
    %c0 = arith.constant 0 : index
    %c0_0 = arith.constant 0 : index
    %0 = vector.load %arg1[%c0, %c0_0] : memref<64x128xf32, #tpu.memory_space<vmem>>, vector<64x128xf32>
    %cst = arith.constant dense<0.000000e+00> : vector<64xf32>
    %1 = vector.multi_reduction <add>, %0, %cst [1] : vector<64x128xf32> to vector<64xf32>
    %2 = vector.shape_cast %1 : vector<64xf32> to vector<64x1xf32>
    %cst_1 = arith.constant 7.812500e-03 : f32
    %3 = vector.broadcast %cst_1 : f32 to vector<64x1xf32>
    %4 = arith.mulf %2, %3 : vector<64x1xf32>
    %5 = arith.mulf %0, %0 : vector<64x128xf32>
    %cst_2 = arith.constant dense<0.000000e+00> : vector<64xf32>
    %6 = vector.multi_reduction <add>, %5, %cst_2 [1] : vector<64x128xf32> to vector<64xf32>
    %7 = vector.shape_cast %6 : vector<64xf32> to vector<64x1xf32>
    %cst_3 = arith.constant 7.812500e-03 : f32
    %8 = vector.broadcast %cst_3 : f32 to vector<64x1xf32>
    %9 = arith.mulf %7, %8 : vector<64x1xf32>
    %10 = arith.mulf %4, %4 : vector<64x1xf32>
    %11 = arith.subf %9, %10 : vector<64x1xf32>
    %cst_4 = arith.constant 0.000000e+00 : f32
    %12 = vector.broadcast %cst_4 : f32 to vector<64x1xf32>
    %13 = arith.maximumf %11, %12 : vector<64x1xf32>
    %cst_5 = arith.constant 9.99999974E-6 : f32
    %14 = vector.broadcast %cst_5 : f32 to vector<64x1xf32>
    %15 = arith.addf %13, %14 : vector<64x1xf32>
    %16 = math.rsqrt %15 : vector<64x1xf32>
    %c0_6 = arith.constant 0 : index
    %c0_7 = arith.constant 0 : index
    %17 = vector.load %arg2[%c0_6, %c0_7] : memref<1x128xf32, #tpu.memory_space<vmem>>, vector<1x128xf32>
    %18 = vector.broadcast %16 : vector<64x1xf32> to vector<64x128xf32>
    %19 = vector.broadcast %17 : vector<1x128xf32> to vector<64x128xf32>
    %20 = arith.mulf %18, %19 : vector<64x128xf32>
    %21 = arith.mulf %0, %20 : vector<64x128xf32>
    %c0_8 = arith.constant 0 : index
    %c0_9 = arith.constant 0 : index
    %22 = vector.load %arg3[%c0_8, %c0_9] : memref<64x128xf32, #tpu.memory_space<vmem>>, vector<64x128xf32>
    tpu.vector_store %arg3[%c0_8, %c0_9], %21 {strides = array<i32>} : memref<64x128xf32, #tpu.memory_space<vmem>>, vector<64x128xf32>,
    return
  }
  func.func @transform_0(%arg0: i32) -> (i32, i32) {
    %c0_i32 = arith.constant 0 : i32
    %c0_i32_0 = arith.constant 0 : i32
    return %arg0, %c0_i32 : i32, i32
  }
  func.func @transform_1(%arg0: i32) -> (i32, i32) {
    %c0_i32 = arith.constant 0 : i32
    %c0_i32_0 = arith.constant 0 : i32
    %c0_i32_1 = arith.constant 0 : i32
    return %c0_i32, %c0_i32_0 : i32, i32
  }
  func.func @transform_2(%arg0: i32) -> (i32, i32) {
    %c0_i32 = arith.constant 0 : i32
    %c0_i32_0 = arith.constant 0 : i32
    return %arg0, %c0_i32 : i32, i32
  }
}

</mosaic_0001>

<bundles_post_ra>
// kernel: tpu_custom_call.1
= control target key start
LH: loop header
LB: loop body
LE: loop exit
PB: predicated region body
PF: predicated region fallthrough
CT: control target
= control target key end

     0   :  { %7 = vsyncpa [#allocation3], 0  ;;  %s983_s0 = inlined_call_operand.hbm [shape: f32[128,128], index: 0, kind: input, shape index: {}]   ;;  %s984_s1 = inlined_call_operand.hbm [shape: f32[1,128], index: 1, kind: input, shape index: {}]   ;;  %s985_s2 = inlined_call_operand.hbm [shape: f32[128,128], index: 2, kind: output, shape index: {}]  }
   0x1   :  { %9 = vsyncpa [#allocation3 + $0x1], 0 }
   0x2   :  { %10 = vsyncpa [#allocation6], 0 }
   0x3   :  { %11 = vsyncpa [#allocation4], 0 }
   0x4   :  { %13 = vsyncpa [#allocation4 + $0x1], 0  ;;  %s732_s9 = smov 0   ;;  %s734_s10 = smov 0  }
   0x5   :  { %s736_s11 = smov 0   ;;  %s738_s12 = smov 0  }
   0x6 LB: > { %s753_s13 = sadd.s32 4294967295, %s710_s12   ;;  %s484_s14 = sadd.s32 4294967294, %s710_s12   ;;  %s710_s12 = sphi %s738_s12, %s996_s12   ;;  %s706_s11 = sphi %s736_s11, %s995_s11   ;;  %s702_s10 = sphi %s734_s10, %s994_s10   ;;  %s698_s9 = sphi %s732_s9, %s993_s9  }
   0x7   : > { %s757_s15 = sadd.s32 1, %s710_s12   ;;  %s26_s16 = sadd.s32 1, %s706_s11 }
   0x8   : > { %s23_s17 = ssub.s32 %s710_s12, %s757_s15  ;;  %p33_p0 = scmp.ne.s32.totalorder %s706_s11, %s702_s10 }
   0x9   : > { %p24_p1 = scmp.eq.s32.totalorder %s23_s17, 0  ;;  %p34_p2 = scmp.eq.s32.totalorder %s710_s12, 0 }
   0xa   : > { %p39_p3 = scmp.ne.s32.totalorder %s702_s10, %s698_s9  ;;  %p40_p4 = scmp.eq.s32.totalorder %s753_s13, 0 }
   0xb   : > { %s769_s18 = scalar_select %p24_p1, %s706_s11, %s26_s16  }
   0xc   : > { %p771_p5 = por %p34_p2, %p33_p0  ;;  %p777_p6 = por %p40_p4, %p39_p3 }
   0xd   : > { %p84_p7 = scmp.eq.s32.totalorder %s753_s13, 1  ;;  %p90_p8 = scmp.eq.s32.totalorder %s484_s14, 1 }
   0xe   : > { %p485_p9 = scmp.ge.s32.totalorder %s710_s12, 1  ;;  %p97_p10 = scmp.lt.s32.totalorder %s710_s12, 3 }
   0xf   : > { %p784_p11 = por %p84_p7, %p33_p0  ;;  %p788_p12 = por %p90_p8, %p39_p3 }
  0x10   : > { %p792_p13 = pnand %p485_p9, %p97_p10  ;;  %s109_s26 = sshll.u32 %s984_s1, 4  ;;  %s110_s26 = int_to_ptr.hbm [resolvable:$true] %s109_s26 }
  0x11   : > { %s712_s27 = smov [#allocation5]   ;;  %p523_p3 = scmp.lt.s32.totalorder %s710_s12, 2 }
  0x12   : > { %p510_p1 = pneg %p792_p13  ;;  %s111_s28 = sshll.u32 %s712_s27, 4  ;;  %s112_s28 = int_to_ptr.vmem [resolvable:$true] %s111_s28 }
  0x13   : > { %s122_s29 = sand.u32 1, %s706_s11   ;;  %p808_p7 = pnand %p523_p3, %p771_p5 }
  0x14   : > { %p511_p2 = pnand %p510_p1, %p40_p4  ;;  %s488_s3 = sshll.u32 %s122_s29, 6 }
  0x15   : > { %s500_s4 = sshll.u32 %s710_s12, 6  ;;  %s126_s14 = scalar_lea.vmem [#allocation2], %s488_s3 }
  0x16   : > { %513 = dma.hbm_to_vmem [thread:$0]  (!%p511_p2), %s110_s26, 16, %s112_s28, [#allocation6]  }
  0x17   : > { %s131_s7 = scalar_lea.hbm %s983_s0, %s500_s4  ;;  %s134_s16 = sshll.u32 %s126_s14, 4  ;;  %s135_s16 = int_to_ptr.vmem [resolvable:$true] %s134_s16 }
  0x18   : > { %s132_s8 = sshll.u32 %s131_s7, 4  ;;  %s123_s17 = scalar_lea.sflag [#allocation3], %s122_s29  ;;  %s133_s8 = int_to_ptr.hbm [resolvable:$true] %s132_s8 }
  0x19   : > { %s610_s24 = sshra.s32 %s133_s8, 4  ;;  %p614_p8 = pneg %p808_p7  ;;  %s611_s24 = int_to_ptr.hbm [resolvable:$true] %s610_s24 }
  0x1a   : > { %s612_s19 = scalar_lea.hbm %s611_s24, 64  ;;  %s617_s27 = scalar_lea.hbm %s983_s0, 128 }
  0x1b   : > { %p613_p5 = scmp.ne.s32.totalorder %s611_s24, %s612_s19  ;;  %p618_p1 = scmp.lt.s32.totalorder %s611_s24, %s983_s0 }
  0x1c   : > { %p619_p2 = scmp.lt.s32.totalorder %s617_s27, %s612_s19 }
  0x1d   : > { %p615_p9 = pnand %p614_p8, %p613_p5 }
  0x1e   : > { %p620_p3 = por %p619_p2, %p618_p1 }
  0x1f   : > { %p616_p10 = pneg %p615_p9 }
  0x21   : > { %p621_p0 = pnand %p620_p3, %p616_p10 }
  0x23   : > { %624 = shalt.err (!%p621_p0)
}
  0x24   : > { %s713_s29 = smov 128   ;;  %s714_s3 = smov 8  }
  0x25   : > { %517 = dma.hbm_to_vmem [thread:$0]  (!%p808_p7), %s133_s8, 1024, %s135_s16, %s123_s17, %s713_s29, %s713_s29, %s714_s3  }
  0x26   : > { %146 = sbr.rel (%p792_p13) target bundleno = 239 (0xef), region = 28  ;;  %s829_s5 = sand.u32 (!%p792_p13), 1, %s702_s10  }
  0x27   : > { %s492_s6 = sshll.u32 (!%p792_p13), %s829_s5, 6  ;;  %s149_s7 = scalar_lea.sflag (!%p792_p13), [#allocation3], %s829_s5 }
  0x28   : > { %s152_s14 = scalar_lea.vmem (!%p792_p13), [#allocation2], %s492_s6 }
  0x2b   : > { %685 = dma.done.wait (%p777_p6), %s149_s7, 1024  }
  0x2c   : > { %687 = vsyncadd (%p777_p6), %s149_s7, 4294966272 }
  0x2d   : > { %689 = dma.done.wait (%p40_p4), [#allocation6], 16  }
  0x2e   : > { %691 = vsyncadd (%p40_p4), [#allocation6], 4294967280  ;;  %v843_v0 = vld [vmem:[%s152_s14 + $0x20] sm:$0xff]  ;;  %v845_v1 = vld [vmem:[%s152_s14 + $0x10] sm:$0xff]  ;;  %s913_s20 = scalar_lea.vmem [#allocation7], %s492_s6  ;;  %s501_s23 = sshll.u32 %s753_s13, 6 }
  0x2f   : > { %v847_v2 = vld [vmem:[%s152_s14] sm:$0xff]  ;;  %197 = vadd.xlane.f32.xlu2 %v843_v0  ;;  %193 = vadd.xlane.f32.xlu1 %v845_v1  ;;  %v852_v3 = vld [vmem:[%s152_s14 + $0x28] sm:$0xff]  ;;  %v854_v4 = vld [vmem:[%s152_s14 + $0x18] sm:$0xff]  ;;  %v215_v9 = vmul.f32 %v845_v1, %v845_v1  ;;  %v217_v14 = vmul.f32 %v843_v0, %v843_v0  ;;  %s397_s16 = scalar_lea.hbm %s985_s2, %s501_s23  ;;  %s398_s17 = sshll.u32 %s913_s20, 4  ;;  %s399_s17 = int_to_ptr.vmem [resolvable:$true] %s398_s17 }
  0x30   : > { %189 = vadd.xlane.f32.xlu0 %v847_v2  ;;  %v856_v5 = vld [vmem:[%s152_s14 + $0x8] sm:$0xff]  ;;  %v213_v6 = vmul.f32 %v847_v2, %v847_v2  ;;  %v863_v7 = vld [vmem:[%s152_s14 + $0x38] sm:$0xff]  ;;  %v865_v8 = vld [vmem:[%s152_s14 + $0x30] sm:$0xff]  ;;  %v216_v10 = vmul.f32 %v854_v4, %v854_v4  ;;  %v218_v12 = vmul.f32 %v852_v3, %v852_v3  ;;  %s400_s24 = sshll.u32 %s397_s16, 4  ;;  %s386_s13 = scalar_lea.sflag [#allocation4], %s829_s5  ;;  %s401_s24 = int_to_ptr.hbm [resolvable:$true] %s400_s24 }
  0x31   : > { %v214_v11 = vmul.f32 %v856_v5, %v856_v5  ;;  %v219_v13 = vmul.f32 %v865_v8, %v865_v8  ;;  %v220_v15 = vmul.f32 %v863_v7, %v863_v7  ;;  %s654_s19 = sshra.s32 %s401_s24, 4  ;;  %s660_s28 = scalar_lea.hbm %s985_s2, 128  ;;  %s655_s19 = int_to_ptr.hbm [resolvable:$true] %s654_s19 }
  0x32   : > { %s656_s25 = scalar_lea.hbm %s655_s19, 64  ;;  %p661_p0 = scmp.lt.s32.totalorder %s655_s19, %s985_s2 }
  0x33   : > { %p657_p4 = scmp.ne.s32.totalorder %s655_s19, %s656_s25  ;;  %p662_p7 = scmp.lt.s32.totalorder %s660_s28, %s656_s25 }
  0x35   : > { %p658_p6 = pnand %p657_p4, %p784_p11  ;;  %p663_p5 = por %p662_p7, %p661_p0 }
  0x37   : > { %199 = vadd.xlane.f32.xlu2 %v852_v3  ;;  %195 = vadd.xlane.f32.xlu1 %v854_v4  ;;  %p659_p13 = pneg %p658_p6 }
  0x38   : > { %191 = vadd.xlane.f32.xlu0 %v856_v5 }
  0x39   : > { %p664_p8 = pnand %p663_p5, %p659_p13 }
  0x3f   : > { %203 = vadd.xlane.f32.xlu1 %v863_v7  ;;  %221 = vadd.xlane.f32.xlu2 %v213_v6 }
  0x40   : > { %201 = vadd.xlane.f32.xlu0 %v865_v8 }
  0x47   : > { %225 = vadd.xlane.f32.xlu1 %v215_v9  ;;  %227 = vadd.xlane.f32.xlu2 %v216_v10 }
  0x48   : > { %223 = vadd.xlane.f32.xlu0 %v214_v11 }
  0x4f   : > { %231 = vadd.xlane.f32.xlu1 %v218_v12  ;;  %233 = vadd.xlane.f32.xlu2 %v219_v13 }
  0x50   : > { %229 = vadd.xlane.f32.xlu0 %v217_v14 }
  0x58   : > { %235 = vadd.xlane.f32.xlu0 %v220_v15 }
  0xa2   : > { %v198_v16 = vpop.xlane.xlu2 %197  ;;  %v194_v17 = vpop.xlane.xlu1 %193 }
  0xa3   : > { %v190_v18 = vpop.xlane.xlu0 %189  ;;  %v207_v29 = vmul.f32 0.0078125, %v194_v17  ;;  %v209_v49 = vmul.f32 0.0078125, %v198_v16 }
  0xa4   : > { %v205_v22 = vmul.f32 0.0078125, %v190_v18 }
  0xa5   : > { %v247_v34 = vmul.f32 %v207_v29, %v207_v29  ;;  %v249_v62 = vmul.f32 %v209_v49, %v209_v49 }
  0xa6   : > { %v245_v25 = vmul.f32 %v205_v22, %v205_v22 }
  0xaa   : > { %v200_v19 = vpop.xlane.xlu2 %199  ;;  %v196_v20 = vpop.xlane.xlu1 %195 }
  0xab   : > { %v192_v21 = vpop.xlane.xlu0 %191  ;;  %v208_v30 = vmul.f32 0.0078125, %v196_v20  ;;  %v210_v46 = vmul.f32 0.0078125, %v200_v19  ;;  %v894_v19 = vld [vmem:[#allocation5] ss:$0 sm:$0xff] }
  0xac   : > { %v206_v32 = vmul.f32 0.0078125, %v192_v21 }
  0xad   : > { %v248_v37 = vmul.f32 %v208_v30, %v208_v30  ;;  %v250_v59 = vmul.f32 %v210_v46, %v210_v46 }
  0xae   : > { %v246_v41 = vmul.f32 %v206_v32, %v206_v32 }
  0xb2   : > { %v883_v23 = vpop.xlane.xlu1 %203  ;;  %v222_v24 = vpop.xlane.xlu2 %221 }
  0xb3   : > { %v202_v26 = vpop.xlane.xlu0 %201  ;;  %v237_v27 = vmul.f32 0.0078125, %v222_v24 }
  0xb4   : > { %v211_v52 = vmul.f32 0.0078125, %v202_v26 }
  0xb5   : > { %v253_v28 = vsub.f32 %v237_v27, %v245_v25 }
  0xb6   : > { %v251_v9 = vmul.f32 %v211_v52, %v211_v52 }
  0xb7   : > { %v261_v31 = vmax.f32 %v253_v28, 0.0  ;;  %v212_v28 = vmul.f32 0.0078125, %v883_v23 }
  0xb9   : > { %v269_v33 = vadd.f32 1e-05, %v261_v31 }
  0xba   : > { %v226_v35 = vpop.xlane.xlu1 %225  ;;  %v228_v36 = vpop.xlane.xlu2 %227 }
  0xbb   : > { %564 = vrsqrt.f32 %v269_v33  ;;  %v239_v38 = vmul.f32 0.0078125, %v226_v35  ;;  %v224_v39 = vpop.xlane.xlu0 %223  ;;  %v240_v40 = vmul.f32 0.0078125, %v228_v36  ;;  %vm283_vm1 = vweird.f32 %v269_v33 }
  0xbc   : > { %v238_v42 = vmul.f32 0.0078125, %v224_v39  ;;  %v252_v39 = vmul.f32 %v212_v28, %v212_v28 }
  0xbd   : > { %v255_v43 = vsub.f32 %v239_v38, %v247_v34  ;;  %v256_v44 = vsub.f32 %v240_v40, %v248_v37 }
  0xbe   : > { %v254_v45 = vsub.f32 %v238_v42, %v246_v41 }
  0xbf   : > { %v263_v47 = vmax.f32 %v255_v43, 0.0  ;;  %v264_v48 = vmax.f32 %v256_v44, 0.0 }
  0xc0   : > { %v262_v50 = vmax.f32 %v254_v45, 0.0 }
  0xc1   : > { %v565_v51 = vpop.eup %564  ;;  %v885_v53 = vadd.f32 1e-05, %v263_v47  ;;  %v887_v54 = vadd.f32 1e-05, %v264_v48 }
  0xc2   : > { %v278_v55 = vmul.f32 %v565_v51, %v269_v33  ;;  %v889_v56 = vadd.f32 1e-05, %v262_v50  ;;  %v232_v57 = vpop.xlane.xlu1 %231  ;;  %v234_v58 = vpop.xlane.xlu2 %233  ;;  %vm284_vm0 = vweird.f32 %v565_v51 }
  0xc3   : > { %566 = vrsqrt.f32 %v885_v53  ;;  %v242_v60 = vmul.f32 0.0078125, %v232_v57  ;;  %v230_v61 = vpop.xlane.xlu0 %229  ;;  %v243_v11 = vmul.f32 0.0078125, %v234_v58  ;;  %vm285_vm2 = vmor %vm283_vm1, %vm284_vm0  ;;  %vm303_vm4 = vweird.f32 %v885_v53 }
  0xc4   : > { %v279_v63 = vmul.f32 %v565_v51, %v278_v55  ;;  %568 = vrsqrt.f32 %v889_v56  ;;  %v241_v6 = vmul.f32 0.0078125, %v230_v61  ;;  %vm293_vm8 = vweird.f32 %v889_v56 }
  0xc5   : > { %570 = vrsqrt.f32 %v887_v54  ;;  %v258_v10 = vsub.f32 %v242_v60, %v250_v59  ;;  %v259_v15 = vsub.f32 %v243_v11, %v251_v9  ;;  %vm313_vm9 = vweird.f32 %v887_v54 }
  0xc6   : > { %v280_v12 = vmul.f32 0.5, %v279_v63  ;;  %v257_v13 = vsub.f32 %v241_v6, %v249_v62 }
  0xc7   : > { %v266_v14 = vmax.f32 %v258_v10, 0.0  ;;  %v267_v26 = vmax.f32 %v259_v15, 0.0 }
  0xc8   : > { %v281_v16 = vsub.f32 1.5, %v280_v12  ;;  %v265_v17 = vmax.f32 %v257_v13, 0.0 }
  0xc9   : > { %v567_v18 = vpop.eup %566  ;;  %v896_v20 = vadd.f32 1e-05, %v266_v14  ;;  %v907_v38 = vadd.f32 1e-05, %v267_v26 }
  0xca   : > { %v569_v21 = vpop.eup %568  ;;  %v282_v22 = vmul.f32 %v565_v51, %v281_v16  ;;  %v298_v24 = vmul.f32 %v567_v18, %v885_v53  ;;  %v899_v25 = vadd.f32 1e-05, %v265_v17  ;;  %vm304_vm3 = vweird.f32 %v567_v18 }
  0xcb   : > { %v571_v27 = vpop.eup %570  ;;  %v288_v29 = vmul.f32 %v569_v21, %v889_v56  ;;  %572 = vrsqrt.f32 %v896_v20  ;;  %v236_v30 = vpop.xlane.xlu0 %235  ;;  %vm294_vm5 = vweird.f32 %v569_v21  ;;  %vm305_vm7 = vmor %vm303_vm4, %vm304_vm3  ;;  %vm333_vm13 = vweird.f32 %v896_v20 }
  0xcc   : > { %v286_v31 = vsel %vm285_vm2, %v565_v51, %v282_v22  ;;  %v299_v32 = vmul.f32 %v567_v18, %v298_v24  ;;  %v308_v33 = vmul.f32 %v571_v27, %v887_v54  ;;  %574 = vrsqrt.f32 %v899_v25  ;;  %vm295_vm10 = vmor %vm293_vm8, %vm294_vm5 }
  0xcd   : > { %v361_v34 = vmul.f32 %v894_v19, %v286_v31  ;;  %v289_v35 = vmul.f32 %v569_v21, %v288_v29  ;;  %v244_v23 = vmul.f32 0.0078125, %v236_v30  ;;  %576 = vrsqrt.f32 %v907_v38 }
  0xce   : > { %v300_v36 = vmul.f32 0.5, %v299_v32  ;;  %v309_v37 = vmul.f32 %v571_v27, %v308_v33  ;;  %vm314_vm6 = vweird.f32 %v571_v27  ;;  %vm323_vm0 = vweird.f32 %v899_v25 }
  0xcf   : > { %v369_v40 = vmul.f32 %v361_v34, %v847_v2  ;;  %v290_v41 = vmul.f32 0.5, %v289_v35  ;;  %v260_v46 = vsub.f32 %v244_v23, %v252_v39  ;;  %vm315_vm11 = vmor %vm313_vm9, %vm314_vm6  ;;  %vm343_vm3 = vweird.f32 %v907_v38 }
  0xd0   : > { %v301_v42 = vsub.f32 1.5, %v300_v36  ;;  %v310_v43 = vmul.f32 0.5, %v309_v37 }
  0xd1   : > { %v573_v44 = vpop.eup %572  ;;  %377 = vst [vmem:[%s913_s20] sm:$0xff] %v369_v40  ;;  %v291_v45 = vsub.f32 1.5, %v290_v41  ;;  %v268_v51 = vmax.f32 %v260_v46, 0.0 }
  0xd2   : > { %v302_v47 = vmul.f32 %v567_v18, %v301_v42  ;;  %v311_v48 = vsub.f32 1.5, %v310_v43  ;;  %v328_v2 = vmul.f32 %v573_v44, %v896_v20  ;;  %v575_v49 = vpop.eup %574  ;;  %vm334_vm12 = vweird.f32 %v573_v44 }
  0xd3   : > { %v292_v50 = vmul.f32 %v569_v21, %v291_v45  ;;  %v318_v57 = vmul.f32 %v575_v49, %v899_v25  ;;  %v276_v60 = vadd.f32 1e-05, %v268_v51  ;;  %v577_v61 = vpop.eup %576  ;;  %vm324_vm14 = vweird.f32 %v575_v49  ;;  %vm335_vm15 = vmor %vm333_vm13, %vm334_vm12 }
  0xd4   : > { %v306_v52 = vsel %vm305_vm7, %v567_v18, %v302_v47  ;;  %v312_v53 = vmul.f32 %v571_v27, %v311_v48  ;;  %v329_v55 = vmul.f32 %v573_v44, %v328_v2  ;;  %v338_v10 = vmul.f32 %v577_v61, %v907_v38  ;;  %vm325_vm1 = vmor %vm323_vm0, %vm324_vm14 }
  0xd5   : > { %v363_v58 = vmul.f32 %v894_v19, %v306_v52  ;;  %v296_v59 = vsel %vm295_vm10, %v569_v21, %v292_v50  ;;  %v319_v63 = vmul.f32 %v575_v49, %v318_v57  ;;  %578 = vrsqrt.f32 %v276_v60 }
  0xd6   : > { %v362_v56 = vmul.f32 %v894_v19, %v296_v59  ;;  %v316_v62 = vsel %vm315_vm11, %v571_v27, %v312_v53  ;;  %v330_v54 = vmul.f32 0.5, %v329_v55  ;;  %v339_v15 = vmul.f32 %v577_v61, %v338_v10 }
  0xd7   : > { %v371_v6 = vmul.f32 %v363_v58, %v845_v1  ;;  %v364_v9 = vmul.f32 %v894_v19, %v316_v62  ;;  %v320_v13 = vmul.f32 0.5, %v319_v63  ;;  %vm344_vm2 = vweird.f32 %v577_v61 }
  0xd8   : > { %v370_v11 = vmul.f32 %v362_v56, %v856_v5  ;;  %v331_v12 = vsub.f32 1.5, %v330_v54  ;;  %v340_v17 = vmul.f32 0.5, %v339_v15  ;;  %vm345_vm4 = vmor %vm343_vm3, %vm344_vm2  ;;  %vm353_vm6 = vweird.f32 %v276_v60 }
  0xd9   : > { %379 = vst [vmem:[%s913_s20 + $0x10] sm:$0xff] %v371_v6  ;;  %v372_v14 = vmul.f32 %v364_v9, %v854_v4  ;;  %v321_v1 = vsub.f32 1.5, %v320_v13 }
  0xda   : > { %378 = vst [vmem:[%s913_s20 + $0x8] sm:$0xff] %v370_v11  ;;  %v332_v16 = vmul.f32 %v573_v44, %v331_v12  ;;  %v341_v4 = vsub.f32 1.5, %v340_v17 }
  0xdb   : > { %380 = vst [vmem:[%s913_s20 + $0x18] sm:$0xff] %v372_v14  ;;  %v322_v5 = vmul.f32 %v575_v49, %v321_v1  ;;  %v579_v22 = vpop.eup %578 }
  0xdc   : > { %v336_v18 = vsel %vm335_vm15, %v573_v44, %v332_v16  ;;  %v342_v27 = vmul.f32 %v577_v61, %v341_v4  ;;  %v348_v28 = vmul.f32 %v579_v22, %v276_v60  ;;  %vm354_vm5 = vweird.f32 %v579_v22 }
  0xdd   : > { %v366_v21 = vmul.f32 %v894_v19, %v336_v18  ;;  %v326_v20 = vsel %vm325_vm1, %v575_v49, %v322_v5  ;;  %vm355_vm7 = vmor %vm353_vm6, %vm354_vm5 }
  0xde   : > { %v365_v26 = vmul.f32 %v894_v19, %v326_v20  ;;  %v346_v29 = vsel %vm345_vm4, %v577_v61, %v342_v27  ;;  %v349_v30 = vmul.f32 %v579_v22, %v348_v28 }
  0xdf   : > { %v374_v24 = vmul.f32 %v366_v21, %v852_v3  ;;  %v367_v31 = vmul.f32 %v894_v19, %v346_v29 }
  0xe0   : > { %v373_v25 = vmul.f32 %v365_v26, %v843_v0  ;;  %v350_v32 = vmul.f32 0.5, %v349_v30 }
  0xe1   : > { %382 = vst [vmem:[%s913_s20 + $0x28] sm:$0xff] %v374_v24  ;;  %v375_v3 = vmul.f32 %v367_v31, %v865_v8 }
  0xe2   : > { %381 = vst [vmem:[%s913_s20 + $0x20] sm:$0xff] %v373_v25  ;;  %v351_v33 = vsub.f32 1.5, %v350_v32 }
  0xe3   : > { %383 = vst [vmem:[%s913_s20 + $0x30] sm:$0xff] %v375_v3 }
  0xe4   : > { %v352_v34 = vmul.f32 %v579_v22, %v351_v33 }
  0xe6   : > { %v356_v0 = vsel %vm355_vm7, %v579_v22, %v352_v34 }
  0xe7   : > { %v368_v35 = vmul.f32 %v894_v19, %v356_v0 }
  0xe9   : > { %v376_v8 = vmul.f32 %v368_v35, %v863_v7 }
  0xeb   : > { %384 = vst [vmem:[%s913_s20 + $0x38] sm:$0xff] %v376_v8 }
  0xec   : > { %667 = shalt.err (!%p664_p8)
}
  0xed   : > { %s715_s3 = smov 128   ;;  %s716_s5 = smov 8  }
  0xee   : > { %508 = dma.vmem_to_hbm [thread:$0]  (%p784_p11), %s399_s17, 1024, %s401_s24, %s386_s13, %s715_s3, %s715_s3, %s716_s5  }
  0xef PF: > { %s415_s6 = sand.u32 1, %s698_s9   ;;  %p992_p9 = scmp.ge.s32.totalorder %s710_s12, 2 }
  0xf0   : > { %s416_s7 = scalar_lea.sflag [#allocation4], %s415_s6 }
  0xf1   : > { %p519_p10 = pnand %p992_p9, %p788_p12 }
  0xf3   : > { %p520_p1 = pneg %p519_p10 }
  0xf5   : > { %693 = dma.done.wait (%p520_p1), %s416_s7, 1024  }
  0xf6   : > { %695 = vsyncadd (%p520_p1), %s416_s7, 4294966272  ;;  %p16_p2 = scmp.ge.s32.totalorder %s757_s15, 4   ;;  %s993_s9 = smov %s702_s10 }
  0xf7   : > { %s994_s10 = smov %s706_s11  ;;  %s995_s11 = smov %s769_s18 }
  0xf8   : > { %s996_s12 = smov %s757_s15  ;;  %18 = sbr.rel (!%p16_p2) target bundleno = 6 (0x6), region = 77 }
  0xfd   :  { %422 = vsyncpa [#allocation3], 1 }
  0xfe   :  { %424 = vsyncpa [#allocation3 + $0x1], 1 }
  0xff   :  { %425 = vsyncpa [#allocation6], 1 }
 0x100   :  { %426 = vsyncpa [#allocation4], 1 }
 0x101   :  { %428 = vsyncpa [#allocation4 + $0x1], 1 }

</bundles_post_ra>
